<compile_context>
chip_gen: v5e
topology: v5e:2x2
jax: 0.10.0
libtpu: 0.0.40
codegen_flags: <defaults>
</compile_context>

<pallas_src>
import numpy as np

import jax
import jax.numpy as jnp
from jax import lax
from jax.experimental import pallas as pl
from jax.experimental.pallas import tpu as pltpu


LANE = 128
SUBLANE = 8
# Rows (nodes) per grid step.  8192 x 16 f32 input = 512 KiB DMA per step; total VMEM
# (double-buffered input + f32/bf16 intermediates) stays well inside the 32 MiB scoped
# default on v5e / v6e / v7x.
DEFAULT_TILE_N = 8192


def _round_up(x, m):
    return (x + m - 1) // m * m


# ---------------------------------------------------------------------------
# Kernel: per node tile
#   h = relu(x @ W1' + b1')          (W1' = Wu @ W1 folded, bf16 MXU / f32 acc)
#   h = relu(h @ W2  + b2 )
#   out[g] += sum over tile rows with graph id g of h    (one-hot matmul on the MXU)
# Padded rows carry gid == g_pad (out of iota range) so they never accumulate.
# ---------------------------------------------------------------------------
def _fused_mlp_segsum_kernel(x_ref, gid_ref, w1_ref, b1_ref, w2_ref, b2_ref, out_ref):
    i = pl.program_id(1)  # tile index inside this core-slab (reduction axis)

    @pl.when(i == 0)
    def _init():
        out_ref[...] = jnp.zeros_like(out_ref)

    x = x_ref[...].astype(jnp.bfloat16)
    h = jnp.dot(x, w1_ref[...], preferred_element_type=jnp.float32) + b1_ref[...]
    h = jnp.maximum(h, 0.0)
    h = jnp.dot(h.astype(jnp.bfloat16), w2_ref[...],
                preferred_element_type=jnp.float32) + b2_ref[...]
    h = jnp.maximum(h, 0.0)

    g_pad = out_ref.shape[0]
    tile = gid_ref.shape[1]
    g_iota = lax.broadcasted_iota(jnp.int32, (g_pad, tile), 0)
    onehot = (g_iota == gid_ref[...]).astype(jnp.bfloat16)  # 0/1 exact in bf16
    out_ref[...] += jnp.dot(onehot, h.astype(jnp.bfloat16),
                            preferred_element_type=jnp.float32)


# ---------------------------------------------------------------------------
# DownstreamModel forward (Pallas version)
# ---------------------------------------------------------------------------
def downstream_model_forward(node_feat, node_counts, params, *, tile_n=DEFAULT_TILE_N):
    """node_feat: (N, node_start_dim) f32; node_counts: STATIC per-graph node counts.
    Returns (num_graphs, g_out_dim) = per-graph mean of the classifier output.

    # TODO(synk): the external graph encoder (self.model / MODEL_REGISTRY) and the
    # edge path (edge_up_dim) have no Pallas equivalent; the encoder is treated as
    # identity (g_hidden_dim == ft_mlp_dim), so edge features never reach the output
    # and the dead edge_up_dim branch is elided.
    """
    assert tile_n % LANE == 0  # only required on the multi-tile path (gid block width)
    node_feat = jnp.asarray(node_feat, jnp.float32)
    n, d_in = node_feat.shape
    num_graphs = len(node_counts)
    assert sum(int(c) for c in node_counts) == n

    d_hid = params["w2"].shape[0]

    # Fold node_up_dim into classifier layer 1 (encoder is identity):
    #   (x @ Wu + bu) @ W1 + b1  ==  x @ (Wu @ W1) + (bu @ W1 + b1)
    wu = jnp.asarray(params["wu"], jnp.float32)
    w1 = jnp.asarray(params["w1"], jnp.float32)
    w1_f = (wu @ w1).astype(jnp.bfloat16)                                  # (d_in, d_hid)
    b1_f = (jnp.asarray(params["bu"], jnp.float32) @ w1
            + jnp.asarray(params["b1"], jnp.float32)).reshape(1, d_hid)    # f32
    w2 = jnp.asarray(params["w2"], jnp.float32).astype(jnp.bfloat16)       # (d_hid, d_hid)
    b2 = jnp.asarray(params["b2"], jnp.float32).reshape(1, d_hid)

    # ---- row tiling + optional 2-way split of the tile axis (both TCs on v7x) ----
    if n <= tile_n:
        tile = _round_up(max(n, SUBLANE), SUBLANE)
        num_splits, tiles_per_split = 1, 1
    else:
        tile = tile_n
        n_tiles = pl.cdiv(n, tile)
        num_splits = 2 if n_tiles >= 2 else 1
        tiles_per_split = pl.cdiv(n_tiles, num_splits)
    n_pad = num_splits * tiles_per_split * tile

    # Pad ROWS only (never lanes): input keeps its real feature width.
    x_p = jnp.pad(node_feat, ((0, n_pad - n), (0, 0)))

    g_pad = _round_up(max(num_graphs, 1), SUBLANE)
    counts = jnp.asarray(np.asarray(node_counts, np.int32))
    # Device-side graph-id construction; padding rows get out-of-range id g_pad.
    gid_core = jnp.repeat(jnp.arange(num_graphs, dtype=jnp.int32), counts,
                          total_repeat_length=n)
    gid = jnp.full((1, n_pad), g_pad, jnp.int32).at[0, :n].set(gid_core)

    resident = lambda r, c: pl.BlockSpec((r, c), lambda s, i: (0, 0))

    seg_sum = pl.pallas_call(
        _fused_mlp_segsum_kernel,
        out_shape=jax.ShapeDtypeStruct((num_splits * g_pad, d_hid), jnp.float32),
        grid=(num_splits, tiles_per_split),
        in_specs=[
            # node tile at real width (auto-pipelined)
            pl.BlockSpec((tile, d_in), lambda s, i: (s * tiles_per_split + i, 0)),
            # graph ids for the tile
            pl.BlockSpec((1, tile), lambda s, i: (0, s * tiles_per_split + i)),
            resident(d_in, d_hid),    # W1' (folded, bf16, VMEM-resident)
            resident(1, d_hid),       # b1' (f32)
            resident(d_hid, d_hid),   # W2  (bf16)
            resident(1, d_hid),       # b2  (f32)
        ],
        # one (g_pad, d_hid) accumulator slab per split (per TensorCore on v7x)
        out_specs=pl.BlockSpec((g_pad, d_hid), lambda s, i: (s, 0)),
        compiler_params=pltpu.CompilerParams(
            dimension_semantics=("parallel", "arbitrary")),
    )(x_p, gid, w1_f, b1_f, w2, b2)

    # Reduce the per-core slabs, turn sums into means, apply the hoisted third layer.
    pooled_sum = seg_sum.reshape(num_splits, g_pad, d_hid).sum(0)[:num_graphs]
    inv = jnp.where(counts > 0,
                    1.0 / jnp.maximum(counts, 1).astype(jnp.float32), 0.0)
    pooled_mean = pooled_sum * inv[:, None]
    w3 = jnp.asarray(params["w3"], jnp.float32)
    b3 = jnp.asarray(params["b3"], jnp.float32).reshape(1, -1)
    return pooled_mean @ w3 + b3


if __name__ == "__main__":
    # small synthetic config consistent with the module's __init__
    node_start_dim = 16
    edge_start_dim = 8
    g_hidden_dim = 32      # == ft_mlp_dim (encoder treated as identity)
    ft_mlp_dim = 32
    g_out_dim = 8

    key = jax.random.PRNGKey(0)
    ks = jax.random.split(key, 13)
    f32 = jnp.float32

    params = {
        "wu": 0.1 * jax.random.normal(ks[0], (node_start_dim, g_hidden_dim), f32),
        "bu": 0.1 * jax.random.normal(ks[1], (1, g_hidden_dim), f32),
        "we": 0.1 * jax.random.normal(ks[2], (edge_start_dim, g_hidden_dim), f32),
        "be": 0.1 * jax.random.normal(ks[3], (1, g_hidden_dim), f32),
        "w1": 0.1 * jax.random.normal(ks[4], (ft_mlp_dim, ft_mlp_dim), f32),
        "b1": 0.1 * jax.random.normal(ks[5], (1, ft_mlp_dim), f32),
        "w2": 0.1 * jax.random.normal(ks[6], (ft_mlp_dim, ft_mlp_dim), f32),
        "b2": 0.1 * jax.random.normal(ks[7], (1, ft_mlp_dim), f32),
        "w3": 0.1 * jax.random.normal(ks[8], (ft_mlp_dim, g_out_dim), f32),
        "b3": 0.1 * jax.random.normal(ks[9], (1, g_out_dim), f32),
    }
    edge_feat = jax.random.normal(ks[12], (20, edge_start_dim), f32)  # dead edge path

    def reference(x, counts):  # pure-JAX f32 forward of the original (unfused) path
        h = x @ params["wu"] + params["bu"]
        h = jnp.maximum(h @ params["w1"] + params["b1"], 0.0)
        h = jnp.maximum(h @ params["w2"] + params["b2"], 0.0)
        h = h @ params["w3"] + params["b3"]
        splits = np.cumsum(np.asarray(counts))[:-1]
        return jnp.stack([p.mean(0) for p in jnp.split(h, splits, axis=0)], 0)

    # Test 1: small batch consistent with the module (2 graphs, 16 nodes, 1 tile).
    node_counts = [6, 10]
    node_feat = jax.random.normal(ks[10], (sum(node_counts), node_start_dim), f32)
    out = downstream_model_forward(node_feat, node_counts, params)
    jax.block_until_ready(out)
    ref = reference(node_feat, node_counts)
    assert out.shape == (len(node_counts), g_out_dim)
    assert jnp.allclose(out, ref, atol=1e-2, rtol=1e-2), "small-batch mismatch"

    # Test 2: multi-tile path (row padding, 2-way core split, cross-tile accumulation).
    node_counts2 = [130, 77, 255, 201, 337]           # 1000 nodes, 5 graphs
    node_feat2 = jax.random.normal(ks[11], (sum(node_counts2), node_start_dim), f32)
    out2 = downstream_model_forward(node_feat2, node_counts2, params, tile_n=128)
    jax.block_until_ready(out2)
    ref2 = reference(node_feat2, node_counts2)
    assert out2.shape == (len(node_counts2), g_out_dim)
    assert jnp.allclose(out2, ref2, atol=1e-2, rtol=1e-2), "multi-tile mismatch"

    print("KERNEL_OK")
</pallas_src>

<mosaic_0001>
module attributes {stable_mosaic.version = 11 : i64} {
  func.func @_fused_mlp_segsum_kernel(%arg0: i32, %arg1: i32, %arg2: memref<16x16xf32, #tpu.memory_space<vmem>>, %arg3: memref<1x16xi32, #tpu.memory_space<vmem>>, %arg4: memref<16x32xbf16, #tpu.memory_space<vmem>>, %arg5: memref<1x32xf32, #tpu.memory_space<vmem>>, %arg6: memref<32x32xbf16, #tpu.memory_space<vmem>>, %arg7: memref<1x32xf32, #tpu.memory_space<vmem>>, %arg8: memref<8x32xf32, #tpu.memory_space<vmem>>) attributes {dimension_semantics = [#tpu.dimension_semantics<parallel>, #tpu.dimension_semantics<arbitrary>], iteration_bounds = array<i64: 1, 1>, scalar_prefetch = 0 : i64, scratch_operands = 0 : i64, tpu.core_type = #tpu.core_type<tc>, window_params = [{transform_indices = @transform_0, window_bounds = array<i64: 16, 16>}, {transform_indices = @transform_1, window_bounds = array<i64: 1, 16>}, {pipeline_mode = #tpu.pipeline_mode<synchronous>, transform_indices = @transform_2, window_bounds = array<i64: 16, 32>}, {pipeline_mode = #tpu.pipeline_mode<synchronous>, transform_indices = @transform_3, window_bounds = array<i64: 1, 32>}, {pipeline_mode = #tpu.pipeline_mode<synchronous>, transform_indices = @transform_4, window_bounds = array<i64: 32, 32>}, {pipeline_mode = #tpu.pipeline_mode<synchronous>, transform_indices = @transform_5, window_bounds = array<i64: 1, 32>}, {transform_indices = @transform_6, window_bounds = array<i64: 8, 32>}]} {
    %c0_i32 = arith.constant 0 : i32
    %0 = arith.cmpi eq, %arg1, %c0_i32 : i32
    %1 = arith.extui %0 : i1 to i32
    %c0_i32_0 = arith.constant 0 : i32
    %2 = arith.cmpi ne, %1, %c0_i32_0 : i32
    scf.if %2 {
      %cst_20 = arith.constant 0.000000e+00 : f32
      %32 = vector.broadcast %cst_20 : f32 to vector<8x32xf32>
      %c0_21 = arith.constant 0 : index
      %c0_22 = arith.constant 0 : index
      %33 = vector.load %arg8[%c0_21, %c0_22] : memref<8x32xf32, #tpu.memory_space<vmem>>, vector<8x32xf32>
      tpu.vector_store %arg8[%c0_21, %c0_22], %32 {strides = array<i32>} : memref<8x32xf32, #tpu.memory_space<vmem>>, vector<8x32xf32>,
    } else {
    }
    %c0 = arith.constant 0 : index
    %c0_1 = arith.constant 0 : index
    %3 = vector.load %arg2[%c0, %c0_1] : memref<16x16xf32, #tpu.memory_space<vmem>>, vector<16x16xf32>
    %4 = arith.truncf %3 : vector<16x16xf32> to vector<16x16xbf16>
    %c0_2 = arith.constant 0 : index
    %c0_3 = arith.constant 0 : index
    %5 = vector.load %arg4[%c0_2, %c0_3] : memref<16x32xbf16, #tpu.memory_space<vmem>>, vector<16x32xbf16>
    %cst = arith.constant dense<0.000000e+00> : vector<16x32xf32>
    %6 = tpu.matmul %4, %5, %cst {dimension_numbers = #tpu.dot_dimension_numbers<[1], [0], [0], [1], [0, 0, 1, 1], [], []>} : vector<16x16xbf16>, vector<16x32xbf16>, vector<16x32xf32> -> vector<16x32xf32>
    %c0_4 = arith.constant 0 : index
    %c0_5 = arith.constant 0 : index
    %7 = vector.load %arg5[%c0_4, %c0_5] : memref<1x32xf32, #tpu.memory_space<vmem>>, vector<1x32xf32>
    %8 = vector.broadcast %7 : vector<1x32xf32> to vector<16x32xf32>
    %9 = arith.addf %6, %8 : vector<16x32xf32>
    %cst_6 = arith.constant 0.000000e+00 : f32
    %10 = vector.broadcast %cst_6 : f32 to vector<16x32xf32>
    %11 = arith.maximumf %9, %10 : vector<16x32xf32>
    %12 = arith.truncf %11 : vector<16x32xf32> to vector<16x32xbf16>
    %c0_7 = arith.constant 0 : index
    %c0_8 = arith.constant 0 : index
    %13 = vector.load %arg6[%c0_7, %c0_8] : memref<32x32xbf16, #tpu.memory_space<vmem>>, vector<32x32xbf16>
    %cst_9 = arith.constant dense<0.000000e+00> : vector<16x32xf32>
    %14 = tpu.matmul %12, %13, %cst_9 {dimension_numbers = #tpu.dot_dimension_numbers<[1], [0], [0], [1], [0, 0, 1, 1], [], []>} : vector<16x32xbf16>, vector<32x32xbf16>, vector<16x32xf32> -> vector<16x32xf32>
    %c0_10 = arith.constant 0 : index
    %c0_11 = arith.constant 0 : index
    %15 = vector.load %arg7[%c0_10, %c0_11] : memref<1x32xf32, #tpu.memory_space<vmem>>, vector<1x32xf32>
    %16 = vector.broadcast %15 : vector<1x32xf32> to vector<16x32xf32>
    %17 = arith.addf %14, %16 : vector<16x32xf32>
    %cst_12 = arith.constant 0.000000e+00 : f32
    %18 = vector.broadcast %cst_12 : f32 to vector<16x32xf32>
    %19 = arith.maximumf %17, %18 : vector<16x32xf32>
    %20 = tpu.iota {dimensions = array<i32: 0>} : vector<8x16xi32>
    %c0_13 = arith.constant 0 : index
    %c0_14 = arith.constant 0 : index
    %21 = vector.load %arg3[%c0_13, %c0_14] : memref<1x16xi32, #tpu.memory_space<vmem>>, vector<1x16xi32>
    %22 = vector.broadcast %21 : vector<1x16xi32> to vector<8x16xi32>
    %23 = arith.cmpi eq, %20, %22 : vector<8x16xi32>
    %24 = arith.extui %23 : vector<8x16xi1> to vector<8x16xi32>
    %25 = arith.sitofp %24 : vector<8x16xi32> to vector<8x16xf32>
    %26 = arith.truncf %25 : vector<8x16xf32> to vector<8x16xbf16>
    %c0_15 = arith.constant 0 : index
    %c0_16 = arith.constant 0 : index
    %27 = vector.load %arg8[%c0_15, %c0_16] : memref<8x32xf32, #tpu.memory_space<vmem>>, vector<8x32xf32>
    %28 = arith.truncf %19 : vector<16x32xf32> to vector<16x32xbf16>
    %cst_17 = arith.constant dense<0.000000e+00> : vector<8x32xf32>
    %29 = tpu.matmul %26, %28, %cst_17 {dimension_numbers = #tpu.dot_dimension_numbers<[1], [0], [0], [1], [0, 0, 1, 1], [], []>} : vector<8x16xbf16>, vector<16x32xbf16>, vector<8x32xf32> -> vector<8x32xf32>
    %30 = arith.addf %27, %29 : vector<8x32xf32>
    %c0_18 = arith.constant 0 : index
    %c0_19 = arith.constant 0 : index
    %31 = vector.load %arg8[%c0_18, %c0_19] : memref<8x32xf32, #tpu.memory_space<vmem>>, vector<8x32xf32>
    tpu.vector_store %arg8[%c0_18, %c0_19], %30 {strides = array<i32>} : memref<8x32xf32, #tpu.memory_space<vmem>>, vector<8x32xf32>,
    return
  }
  func.func @transform_0(%arg0: i32, %arg1: i32) -> (i32, i32) {
    %c1_i32 = arith.constant 1 : i32
    %0 = arith.muli %arg0, %c1_i32 : i32
    %1 = arith.addi %0, %arg1 : i32
    %c0_i32 = arith.constant 0 : i32
    %c0_i32_0 = arith.constant 0 : i32
    return %1, %c0_i32 : i32, i32
  }
  func.func @transform_1(%arg0: i32, %arg1: i32) -> (i32, i32) {
    %c1_i32 = arith.constant 1 : i32
    %0 = arith.muli %arg0, %c1_i32 : i32
    %1 = arith.addi %0, %arg1 : i32
    %c0_i32 = arith.constant 0 : i32
    %c0_i32_0 = arith.constant 0 : i32
    return %c0_i32, %1 : i32, i32
  }
  func.func @transform_2(%arg0: i32, %arg1: i32) -> (i32, i32) {
    %c0_i32 = arith.constant 0 : i32
    %c0_i32_0 = arith.constant 0 : i32
    %c0_i32_1 = arith.constant 0 : i32
    return %c0_i32, %c0_i32_0 : i32, i32
  }
  func.func @transform_3(%arg0: i32, %arg1: i32) -> (i32, i32) {
    %c0_i32 = arith.constant 0 : i32
    %c0_i32_0 = arith.constant 0 : i32
    %c0_i32_1 = arith.constant 0 : i32
    return %c0_i32, %c0_i32_0 : i32, i32
  }
  func.func @transform_4(%arg0: i32, %arg1: i32) -> (i32, i32) {
    %c0_i32 = arith.constant 0 : i32
    %c0_i32_0 = arith.constant 0 : i32
    %c0_i32_1 = arith.constant 0 : i32
    return %c0_i32, %c0_i32_0 : i32, i32
  }
  func.func @transform_5(%arg0: i32, %arg1: i32) -> (i32, i32) {
    %c0_i32 = arith.constant 0 : i32
    %c0_i32_0 = arith.constant 0 : i32
    %c0_i32_1 = arith.constant 0 : i32
    return %c0_i32, %c0_i32_0 : i32, i32
  }
  func.func @transform_6(%arg0: i32, %arg1: i32) -> (i32, i32) {
    %c0_i32 = arith.constant 0 : i32
    %c0_i32_0 = arith.constant 0 : i32
    return %arg0, %c0_i32 : i32, i32
  }
}

</mosaic_0001>

<bundles_post_ra>
// kernel: tpu_custom_call.1
= control target key start
LH: loop header
LB: loop body
LE: loop exit
PB: predicated region body
PF: predicated region fallthrough
CT: control target
= control target key end

     0   :  { %11 = vsyncpa [#allocation3], 0  ;;  %s455_s0 = inlined_call_operand.hbm [shape: f32[16,16], index: 0, kind: input, shape index: {}]   ;;  %s456_s1 = inlined_call_operand.hbm [shape: s32[1,16], index: 1, kind: input, shape index: {}]   ;;  %s457_s2 = inlined_call_operand.hbm [shape: bf16[16,32], index: 2, kind: input, shape index: {}]   ;;  %s458_s3 = inlined_call_operand.vmem [shape: f32[1,32], index: 3, kind: input, shape index: {}]   ;;  %s459_s4 = inlined_call_operand.hbm [shape: bf16[32,32], index: 4, kind: input, shape index: {}]   ;;  %s460_s5 = inlined_call_operand.vmem [shape: f32[1,32], index: 5, kind: input, shape index: {}]   ;;  %s461_s6 = inlined_call_operand.hbm [shape: f32[8,32], index: 6, kind: output, shape index: {}]  }
   0x1   :  { %12 = vsyncpa [#allocation6], 0 }
   0x2   :  { %13 = vsyncpa [#allocation9], 0  ;;  %s39_s23 = sshll.u32 %s456_s1, 4  ;;  %s40_s23 = int_to_ptr.hbm [resolvable:$true] %s39_s23 }
   0x3   :  { %14 = vsyncpa [#allocation4], 0  ;;  %s384_s24 = smov [#allocation5]   ;;  %s23_s28 = sshll.u32 %s455_s0, 4  ;;  %s24_s28 = int_to_ptr.hbm [resolvable:$true] %s23_s28 }
   0x4   :  { %s41_s25 = sshll.u32 %s384_s24, 4  ;;  %s385_s29 = smov [#allocation2]   ;;  %s42_s25 = int_to_ptr.vmem [resolvable:$true] %s41_s25 }
   0x5   :  { %44 = dma.hbm_to_vmem [thread:$0]  %s40_s23, 16, %s42_s25, [#allocation6]  }
   0x6   :  { %s25_s30 = sshll.u32 %s385_s29, 4  ;;  %s386_s7 = smov 128   ;;  %s26_s30 = int_to_ptr.vmem [resolvable:$true] %s25_s30 }
   0x7   :  { %s387_s8 = smov 8   ;;  %s49_s1 = sshll.u32 %s457_s2, 4  ;;  %s50_s1 = int_to_ptr.hbm [resolvable:$true] %s49_s1 }
   0x8   :  { %31 = dma.hbm_to_vmem [thread:$0]  %s24_s28, 256, %s26_s30, [#allocation3], %s386_s7, %s386_s7, %s387_s8  }
   0x9   :  { %s388_s11 = smov [#allocation7]   ;;  %s64_s0 = sshll.u32 %s459_s4, 4  ;;  %s65_s0 = int_to_ptr.hbm [resolvable:$true] %s64_s0 }
   0xa   :  { %s51_s12 = sshll.u32 %s388_s11, 4  ;;  %s389_s15 = smov 64   ;;  %s52_s12 = int_to_ptr.vmem [resolvable:$true] %s51_s12 }
   0xb   :  { %s390_s16 = smov 4   ;;  %s391_s17 = smov [#allocation8]  }
   0xc   :  { %57 = dma.hbm_to_vmem [thread:$0]  %s50_s1, 128, %s52_s12, [#allocation6], %s389_s15, %s389_s15, %s390_s16  }
   0xd   :  { %s66_s18 = sshll.u32 %s391_s17, 4  ;;  %s67_s18 = int_to_ptr.vmem [resolvable:$true] %s66_s18 }
   0xe   :  { %72 = dma.hbm_to_vmem [thread:$0]  %s65_s0, 256, %s67_s18, [#allocation9], %s389_s15, %s389_s15, %s390_s16  }
   0xf   :  { %376 = dma.done.wait [#allocation3], 256  }
  0x10   :  { %377 = vsyncadd [#allocation3], 4294967040 }
  0x11   :  { %378 = dma.done.wait [#allocation6], 144  }
  0x12   :  { %379 = vsyncadd [#allocation6], 4294967152 }
  0x13   :  { %380 = dma.done.wait [#allocation9], 256  }
  0x14   :  { %381 = vsyncadd [#allocation9], 4294967040  ;;  %v240_v0 = vld [vmem:[#allocation7] sm:$0xff]  ;;  %v101_v1 = vld [vmem:[#allocation2] sm:$0xff]  ;;  %vm116_vm0 = vcmask 130048   ;;  %vm99_vm1 = vcmask 261120   ;;  %v177_v16 = vlaneseq }
  0x15   :  { %v102_v2 = vld [vmem:[#allocation2 + $0x8] sm:$0xff]  ;;  %127 = vmatpush.bf16.msra.mxu0 %v240_v0  ;;  %v241_v5 = vld [vmem:[#allocation8] sm:$0xff]  ;;  %v392_v6 = vmov 0.0   ;;  %v255_v19 = vld [vmem:[#allocation5] ss:$0 sm:$0xff] }
  0x16   :  { %v103_v3 = vpack.c.bf16 %v102_v2, %v101_v1  ;;  %v242_v4 = vld [vmem:[#allocation8 + $0x8] sm:$0xff]  ;;  %100 = vst.msk [vmem:[#allocation10] sm:$0xff] %vm99_vm1, %v392_v6  ;;  %v253_v8 = vld [vmem:[%s458_s3] ss:$0 sm:$0xff]  ;;  %v178_v18 = vshrl.u32 %v177_v16, 7  ;;  %s393_s3 = smov [#allocation10]  }
  0x17   :  { %167 = vmatpush.bf16.msra.mxu1 %v242_v4  ;;  %v254_v17 = vld [vmem:[%s460_s5] ss:$0 sm:$0xff]  ;;  %s210_s21 = sshll.u32 %s393_s3, 4  ;;  %s212_s5 = sshll.u32 %s461_s6, 4  ;;  %s211_s21 = int_to_ptr.vmem [resolvable:$true] %s210_s21  ;;  %s213_s5 = int_to_ptr.hbm [resolvable:$true] %s212_s5 }
  0x18   :  { %228 = vmatmul.msk.bf16.vlgmr.msra.gmra.mxu0 %vm116_vm0, %v103_v3  ;;  %vm181_vm2 = vcmp.eq.s32.totalorder %v178_v18, %v255_v19 }
  0x19   :  { %v238_v25 = vsel %vm181_vm2, 1.0, %v392_v6 }
  0x1a   :  { %v184_v27 = vpack.c.bf16 %v238_v25, %v238_v25 }
  0x1b   :  { %168 = vmatpush.bf16.msra.mxu1 %v241_v5 }
  0x1d   :  { %v185_v28 = vld [vmem:[#allocation10] sm:$0xff] }
  0x95   :  { %v129_v7 = vpop.f32.mrf.mxu0 }
  0x96   :  { %v130_v9 = vadd.f32 %v253_v8, %v129_v7 }
  0x98   :  { %v134_v12 = vmax.f32 %v130_v9, 0.0 }
  0x9d   :  { %v131_v10 = vpop.f32.mrf.mxu0 }
  0x9e   :  { %v132_v11 = vadd.f32 %v253_v8, %v131_v10 }
  0xa0   :  { %v135_v13 = vmax.f32 %v132_v11, 0.0 }
  0xa2   :  { %v136_v14 = vpack.c.bf16 %v135_v13, %v134_v12 }
  0xa4   :  { %237 = vmatmul.msk.bf16.vlgmr.msra.gmra.mxu1 %vm99_vm1, %v136_v14 }
 0x121   :  { %v170_v15 = vpop.f32.mrf.mxu1 }
 0x122   :  { %v171_v20 = vadd.f32 %v254_v17, %v170_v15 }
 0x124   :  { %v175_v23 = vmax.f32 %v171_v20, 0.0 }
 0x129   :  { %v172_v21 = vpop.f32.mrf.mxu1 }
 0x12a   :  { %v173_v22 = vadd.f32 %v254_v17, %v172_v21 }
 0x12c   :  { %v176_v24 = vmax.f32 %v173_v22, 0.0 }
 0x12e   :  { %v186_v26 = vpack.c.bf16 %v176_v24, %v175_v23 }
 0x130   :  { %197 = vmatpush.bf16.msra.mxu2 %v186_v26 }
 0x133   :  { %239 = vmatmul.msk.bf16.vlgmr.msra.gmra.mxu2 %vm116_vm0, %v184_v27 }
 0x1b6   :  { %v199_v29 = vpop.f32.mrf.mxu2 }
 0x1b7   :  { %v203_v30 = vadd.f32 %v199_v29, %v185_v28 }
 0x1b9   :  { %204 = vst.msk [vmem:[#allocation10] sm:$0xff] %vm99_vm1, %v203_v30 }
 0x1ba   :  { %215 = dma.vmem_to_hbm [thread:$0]  %s211_s21, 128, %s213_s5, [#allocation4]  }
 0x1be   :  { %v201_v31 = vpop.f32.mrf.mxu2 }
 0x1bf   :  { %382 = dma.done.wait [#allocation4], 128  }
 0x1c0   :  { %383 = vsyncadd [#allocation4], 4294967168 }
 0x1c1   :  { %220 = vsyncpa [#allocation3], 1 }
 0x1c2   :  { %221 = vsyncpa [#allocation6], 1 }
 0x1c3   :  { %222 = vsyncpa [#allocation9], 1 }
 0x1c4   :  { %223 = vsyncpa [#allocation4], 1 }

</bundles_post_ra>
